<compile_context>
chip_gen: v5e
topology: v5e:2x2
jax: 0.10.0
libtpu: 0.0.40
codegen_flags: <defaults>
</compile_context>

<pallas_src>
from functools import partial

import jax
import jax.numpy as jnp
from jax.experimental import pallas as pl
from jax.experimental.pallas import tpu as pltpu


def _basic_block_kernel(x_ref, w1_ref, b1_ref, w2_ref, b2_ref, o_ref):
    # x: (C_in, TP) bf16.  conv1 (1x1, BN1 folded into w1/b1) + ReLU.
    y = jnp.dot(w1_ref[...], x_ref[...], preferred_element_type=jnp.float32)
    y = jnp.maximum(y + b1_ref[...], 0.0)
    # conv2 + bn2 + downsample(conv + bn) + residual add, all folded into
    # (w2_ref, b2_ref) on the host; final ReLU.  Single lane-dense f32 store.
    z = jnp.dot(w2_ref[...], y.astype(jnp.bfloat16),
                preferred_element_type=jnp.float32)
    o_ref[...] = jnp.maximum(z + b2_ref[...], 0.0)


def fold_params(w1, bn1, w2, bn2, wd, bnd, eps=1e-5):
    """Fold eval-mode BNs + downsample chain into two matmuls (host side, once)."""
    def bn_scale_bias(bn):
        gamma, beta, mean, var = bn
        scale = gamma / jnp.sqrt(var + eps)
        return scale, beta - mean * scale

    s1, c1 = bn_scale_bias(bn1)
    s2, c2 = bn_scale_bias(bn2)
    sd, cd = bn_scale_bias(bnd)

    w1f = s1[:, None] * w1                                         # diag(s1) @ W1
    b1 = c1[:, None]
    m = jnp.eye(w2.shape[0], dtype=w2.dtype) + sd[:, None] * wd    # I + diag(sd) @ Wd
    w_eff = m @ (s2[:, None] * w2)                                 # M diag(s2) W2
    b_eff = m @ c2[:, None] + cd[:, None]                          # M b2 + bd
    return (w1f.astype(jnp.bfloat16), b1.astype(jnp.float32),
            w_eff.astype(jnp.bfloat16), b_eff.astype(jnp.float32))


@partial(jax.jit, static_argnames=("stride", "tile_p_target"))
def basic_block_forward(x, folded_params, *, stride=1, tile_p_target=2048):
    """x: NCHW float32. Returns NCHW float32 of shape (N, C2, H_out, W_out)."""
    w1f, b1, w_eff, b_eff = folded_params
    N, C_in, H, W = x.shape
    C2 = w_eff.shape[0]

    # conv1 has kernel_size=1, stride=stride, padding=1: pad spatially by 1,
    # subsample by stride -> every output pixel is an independent matmul column.
    xp = jnp.pad(x, ((0, 0), (0, 0), (1, 1), (1, 1)))
    xs = xp[:, :, ::stride, ::stride]
    Ho, Wo = xs.shape[2], xs.shape[3]
    P_img = Ho * Wo

    # Lane tiling: tile_p is a multiple of 128, as large as possible up to
    # tile_p_target.  For production channel counts size tile_p_target so
    # (C_in + C2) * tile_p * bytes * 2 pipeline buffers fits the scoped VMEM
    # budget of the target generation (v7x: ~32 MiB default of 64 MiB physical).
    lane_units = -(-P_img // 128)
    tile_units = max(1, min(tile_p_target // 128, lane_units))
    tile_p = tile_units * 128
    n_tiles = -(-lane_units // tile_units)
    P_pad = n_tiles * tile_p

    # Free reshape (per-image CHW is already channels-major), pad pixels to a
    # lane-dense multiple of tile_p, cast to bf16 to halve HBM read bytes.
    x_cp = xs.reshape(N, C_in, P_img)
    x_cp = jnp.pad(x_cp, ((0, 0), (0, 0), (0, P_pad - P_img)))
    x_cp = x_cp.astype(jnp.bfloat16)

    grid = (N, n_tiles)   # both axes parallel; N>=2 -> >=2 steps for megacore

    def const_spec(arr):
        # Small grid-invariant operands; Pallas skips re-DMA for blocks whose
        # index does not change across the grid.
        return pl.BlockSpec(arr.shape, lambda n, i: (0, 0))

    out_cp = pl.pallas_call(
        _basic_block_kernel,
        out_shape=jax.ShapeDtypeStruct((N, C2, P_pad), jnp.float32),
        grid=grid,
        in_specs=[
            pl.BlockSpec((None, C_in, tile_p), lambda n, i: (n, 0, i)),
            const_spec(w1f), const_spec(b1),
            const_spec(w_eff), const_spec(b_eff),
        ],
        out_specs=pl.BlockSpec((None, C2, tile_p), lambda n, i: (n, 0, i)),
        compiler_params=pltpu.CompilerParams(
            dimension_semantics=("parallel", "parallel")),
    )(x_cp, w1f, b1, w_eff, b_eff)

    # Padded pixel columns (zero input -> bias-through-ReLU garbage) are
    # sliced off; the reshape back to NCHW is free.
    return out_cp[:, :, :P_img].reshape(N, C2, Ho, Wo)


if __name__ == "__main__":
    key = jax.random.PRNGKey(0)
    N, C_in, H, W = 2, 4, 16, 16
    out_channels = 8
    expansion = 1
    stride = 1
    C1 = out_channels
    C2 = out_channels * expansion
    eps = 1e-5

    keys = jax.random.split(key, 8)
    w1 = jax.random.normal(keys[0], (C1, C_in), jnp.float32) * 0.2   # conv1 (O,I) of (O,I,1,1)
    w2 = jax.random.normal(keys[1], (C2, C1), jnp.float32) * 0.2     # conv2 weight
    wd = jax.random.normal(keys[2], (C2, C2), jnp.float32) * 0.2     # downsample conv weight

    def bn_params(k, c):
        k1, k2, k3, k4 = jax.random.split(k, 4)
        gamma = 1.0 + 0.1 * jax.random.normal(k1, (c,), jnp.float32)
        beta = 0.1 * jax.random.normal(k2, (c,), jnp.float32)
        mean = 0.1 * jax.random.normal(k3, (c,), jnp.float32)
        var = 1.0 + 0.1 * jnp.abs(jax.random.normal(k4, (c,), jnp.float32))
        return gamma, beta, mean, var

    bn1 = bn_params(keys[3], C1)
    bn2 = bn_params(keys[4], C2)
    bnd = bn_params(keys[5], C2)

    x = jax.random.normal(keys[6], (N, C_in, H, W), jnp.float32)

    folded = fold_params(w1, bn1, w2, bn2, wd, bnd, eps=eps)
    out = basic_block_forward(x, folded, stride=stride)
    out = jax.block_until_ready(out)

    # ---- pure-JAX reference mirroring the PyTorch forward (eval-mode BN) ----
    def bn_apply(y, bn):
        gamma, beta, mean, var = bn
        return (gamma[None, :, None, None] * (y - mean[None, :, None, None])
                / jnp.sqrt(var[None, :, None, None] + eps)
                + beta[None, :, None, None])

    xp_ref = jnp.pad(x, ((0, 0), (0, 0), (1, 1), (1, 1)))[:, :, ::stride, ::stride]
    y_ref = jax.nn.relu(bn_apply(jnp.einsum('nchw,oc->nohw', xp_ref, w1), bn1))
    z_ref = bn_apply(jnp.einsum('nchw,oc->nohw', y_ref, w2), bn2)
    r_ref = bn_apply(jnp.einsum('nchw,oc->nohw', z_ref, wd), bnd)
    ref = jax.nn.relu(z_ref + r_ref)

    assert out.shape == ref.shape == (N, C2, H + 2, W + 2), (out.shape, ref.shape)
    max_err = float(jnp.max(jnp.abs(out - ref)))
    # bf16 inputs/weights -> loosened tolerance vs the f32 reference.
    assert jnp.allclose(out, ref, atol=5e-2, rtol=5e-2), max_err
    print("KERNEL_OK")
</pallas_src>

<mosaic_0001>
module attributes {stable_mosaic.version = 11 : i64} {
  func.func @_basic_block_kernel(%arg0: i32, %arg1: i32, %arg2: memref<1x4x384xbf16, #tpu.memory_space<vmem>>, %arg3: memref<8x4xbf16, #tpu.memory_space<vmem>>, %arg4: memref<8x1xf32, #tpu.memory_space<vmem>>, %arg5: memref<8x8xbf16, #tpu.memory_space<vmem>>, %arg6: memref<8x1xf32, #tpu.memory_space<vmem>>, %arg7: memref<1x8x384xf32, #tpu.memory_space<vmem>>) attributes {dimension_semantics = [#tpu.dimension_semantics<parallel>, #tpu.dimension_semantics<parallel>], iteration_bounds = array<i64: 2, 1>, scalar_prefetch = 0 : i64, scratch_operands = 0 : i64, tpu.core_type = #tpu.core_type<tc>, window_params = [{transform_indices = @transform_0, window_bounds = array<i64: 1, 4, 384>}, {pipeline_mode = #tpu.pipeline_mode<synchronous>, transform_indices = @transform_1, window_bounds = array<i64: 8, 4>}, {pipeline_mode = #tpu.pipeline_mode<synchronous>, transform_indices = @transform_2, window_bounds = array<i64: 8, 1>}, {pipeline_mode = #tpu.pipeline_mode<synchronous>, transform_indices = @transform_3, window_bounds = array<i64: 8, 8>}, {pipeline_mode = #tpu.pipeline_mode<synchronous>, transform_indices = @transform_4, window_bounds = array<i64: 8, 1>}, {transform_indices = @transform_5, window_bounds = array<i64: 1, 8, 384>}]} {
    %c0 = arith.constant 0 : index
    %c0_0 = arith.constant 0 : index
    %0 = vector.load %arg3[%c0, %c0_0] : memref<8x4xbf16, #tpu.memory_space<vmem>>, vector<8x4xbf16>
    %c0_1 = arith.constant 0 : index
    %c0_2 = arith.constant 0 : index
    %c0_3 = arith.constant 0 : index
    %1 = vector.load %arg2[%c0_1, %c0_2, %c0_3] : memref<1x4x384xbf16, #tpu.memory_space<vmem>>, vector<1x4x384xbf16>
    %2 = vector.shape_cast %1 : vector<1x4x384xbf16> to vector<4x384xbf16>
    %cst = arith.constant dense<0.000000e+00> : vector<8x384xf32>
    %3 = tpu.matmul %0, %2, %cst {dimension_numbers = #tpu.dot_dimension_numbers<[1], [0], [0], [1], [0, 0, 1, 1], [], []>} : vector<8x4xbf16>, vector<4x384xbf16>, vector<8x384xf32> -> vector<8x384xf32>
    %c0_4 = arith.constant 0 : index
    %c0_5 = arith.constant 0 : index
    %4 = vector.load %arg4[%c0_4, %c0_5] : memref<8x1xf32, #tpu.memory_space<vmem>>, vector<8x1xf32>
    %5 = vector.broadcast %4 : vector<8x1xf32> to vector<8x384xf32>
    %6 = arith.addf %3, %5 : vector<8x384xf32>
    %cst_6 = arith.constant 0.000000e+00 : f32
    %7 = vector.broadcast %cst_6 : f32 to vector<8x384xf32>
    %8 = arith.maximumf %6, %7 : vector<8x384xf32>
    %c0_7 = arith.constant 0 : index
    %c0_8 = arith.constant 0 : index
    %9 = vector.load %arg5[%c0_7, %c0_8] : memref<8x8xbf16, #tpu.memory_space<vmem>>, vector<8x8xbf16>
    %10 = arith.truncf %8 : vector<8x384xf32> to vector<8x384xbf16>
    %cst_9 = arith.constant dense<0.000000e+00> : vector<8x384xf32>
    %11 = tpu.matmul %9, %10, %cst_9 {dimension_numbers = #tpu.dot_dimension_numbers<[1], [0], [0], [1], [0, 0, 1, 1], [], []>} : vector<8x8xbf16>, vector<8x384xbf16>, vector<8x384xf32> -> vector<8x384xf32>
    %c0_10 = arith.constant 0 : index
    %c0_11 = arith.constant 0 : index
    %12 = vector.load %arg6[%c0_10, %c0_11] : memref<8x1xf32, #tpu.memory_space<vmem>>, vector<8x1xf32>
    %13 = vector.broadcast %12 : vector<8x1xf32> to vector<8x384xf32>
    %14 = arith.addf %11, %13 : vector<8x384xf32>
    %cst_12 = arith.constant 0.000000e+00 : f32
    %15 = vector.broadcast %cst_12 : f32 to vector<8x384xf32>
    %16 = arith.maximumf %14, %15 : vector<8x384xf32>
    %c0_13 = arith.constant 0 : index
    %c0_14 = arith.constant 0 : index
    %c0_15 = arith.constant 0 : index
    %17 = vector.load %arg7[%c0_13, %c0_14, %c0_15] : memref<1x8x384xf32, #tpu.memory_space<vmem>>, vector<1x8x384xf32>
    %18 = vector.shape_cast %17 : vector<1x8x384xf32> to vector<8x384xf32>
    %19 = vector.shape_cast %16 : vector<8x384xf32> to vector<1x8x384xf32>
    tpu.vector_store %arg7[%c0_13, %c0_14, %c0_15], %19 {strides = array<i32>} : memref<1x8x384xf32, #tpu.memory_space<vmem>>, vector<1x8x384xf32>,
    return
  }
  func.func @transform_0(%arg0: i32, %arg1: i32) -> (i32, i32, i32) {
    %c0_i32 = arith.constant 0 : i32
    %c0_i32_0 = arith.constant 0 : i32
    return %arg0, %c0_i32, %arg1 : i32, i32, i32
  }
  func.func @transform_1(%arg0: i32, %arg1: i32) -> (i32, i32) {
    %c0_i32 = arith.constant 0 : i32
    %c0_i32_0 = arith.constant 0 : i32
    %c0_i32_1 = arith.constant 0 : i32
    return %c0_i32, %c0_i32_0 : i32, i32
  }
  func.func @transform_2(%arg0: i32, %arg1: i32) -> (i32, i32) {
    %c0_i32 = arith.constant 0 : i32
    %c0_i32_0 = arith.constant 0 : i32
    %c0_i32_1 = arith.constant 0 : i32
    return %c0_i32, %c0_i32_0 : i32, i32
  }
  func.func @transform_3(%arg0: i32, %arg1: i32) -> (i32, i32) {
    %c0_i32 = arith.constant 0 : i32
    %c0_i32_0 = arith.constant 0 : i32
    %c0_i32_1 = arith.constant 0 : i32
    return %c0_i32, %c0_i32_0 : i32, i32
  }
  func.func @transform_4(%arg0: i32, %arg1: i32) -> (i32, i32) {
    %c0_i32 = arith.constant 0 : i32
    %c0_i32_0 = arith.constant 0 : i32
    %c0_i32_1 = arith.constant 0 : i32
    return %c0_i32, %c0_i32_0 : i32, i32
  }
  func.func @transform_5(%arg0: i32, %arg1: i32) -> (i32, i32, i32) {
    %c0_i32 = arith.constant 0 : i32
    %c0_i32_0 = arith.constant 0 : i32
    return %arg0, %c0_i32, %arg1 : i32, i32, i32
  }
}

</mosaic_0001>

<bundles_post_ra>
// kernel: basic_block_forward.1
= control target key start
LH: loop header
LB: loop body
LE: loop exit
PB: predicated region body
PF: predicated region fallthrough
CT: control target
= control target key end

     0   :  { %s585_s18 = smov 0   ;;  %s587_s19 = smov 0   ;;  %s637_s0 = inlined_call_operand.vmem [shape: bf16[2,4,384], index: 0, kind: input, shape index: {}]   ;;  %s638_s1 = inlined_call_operand.vmem [shape: bf16[8,4], index: 1, kind: input, shape index: {}]   ;;  %s639_s2 = inlined_call_operand.vmem [shape: f32[8,1], index: 2, kind: input, shape index: {}]   ;;  %s640_s3 = inlined_call_operand.vmem [shape: bf16[8,8], index: 3, kind: input, shape index: {}]   ;;  %s641_s4 = inlined_call_operand.vmem [shape: f32[8,1], index: 4, kind: input, shape index: {}]   ;;  %s642_s5 = inlined_call_operand.vmem [shape: f32[2,8,384], index: 5, kind: output, shape index: {}]  }
   0x1   :  { %s589_s20 = smov 0  }
   0x2 LB: > { %s27_s21 = sadd.s32 1, %s548_s19  ;;  %p491_p0 = scmp.ge.s32.totalorder %s552_s20, 1  ;;  %s552_s20 = sphi %s589_s20, %s15_s20   ;;  %s548_s19 = sphi %s587_s19, %s644_s19   ;;  %s544_s18 = sphi %s585_s18, %s643_s18  }
   0x3   : > { %p29_p1 = scmp.ge.s32.totalorder %s27_s21, 2  ;;  %p208_p2 = scmp.lt.s32.totalorder %s552_s20, 3 }
   0x5   : > { %s646_s21 = smov (%p29_p1, %s27_s21), 0  ;;  %p209_p3 = pnand %p491_p0, %p208_p2 }
   0x6   : > { %p245_p4 = scmp.lt.s32.totalorder (!%p209_p3), %s544_s18, 1 }
   0x7   : > { %212 = sbr.rel (%p209_p3) target bundleno = 306 (0x132), region = 40 }
   0xc   : > { %v554_v0 = vmov 0   ;;  %v267_v1 = vld [vmem:[%s639_s2] sm:$0xff]  ;;  %s648_s18 = smov (!%p245_p4, %s544_s18), 1  ;;  %vm282_vm0 = vcmask 1041408   ;;  %vm278_vm1 = vcmask 31744   ;;  %vm345_vm2 = vcmask 1043456  }
   0xd   : > { %529 = vset.pattern.permute.xlu0 %v554_v0  ;;  %s502_s24 = smul.u32 6, %s648_s18  ;;  %v335_v3 = vld [vmem:[%s641_s4] sm:$0xff]  ;;  %vm341_vm3 = vcmask 64512  }
   0xe   : > { %270 = vperm.xlu0 %529, %v267_v1   ;;  %v265_v10 = vld [vmem:[%s638_s1] sm:$0xf]  ;;  %s503_s9 = smul.u32 24, %s648_s18 }
   0xf   : > { %s252_s27 = scalar_lea.vmem %s637_s0, %s502_s24  ;;  %v331_v25 = vld [vmem:[%s640_s3] sm:$0xf] }
  0x10   : > { %v266_v2 = vld [vmem:[%s252_s27] sm:$0x3f]  ;;  %s262_s12 = scalar_lea.vmem %s642_s5, %s503_s9 }
  0x11   : > { %274 = vst [vmem:[#allocation1] ss:$4 sm:$0xff] %v266_v2 }
  0x16   : > { %338 = vperm.xlu0 %529, %v335_v3  }
  0x18   : > { %v275_v4 = vld.sshfl [vmem:[#allocation1] sm:$0xff pattern:$0x73625140]  ;;  %v276_v5 = vld.sshfl [vmem:[#allocation1 + $0x8] sm:$0xff pattern:$0x73625140] }
  0x19   : > { %v283_v6 = vsel %vm282_vm0, %v275_v4, 0  ;;  %v285_v7 = vsel %vm282_vm0, %v276_v5, 0  ;;  %v277_v8 = vld.sshfl [vmem:[#allocation1 + $0x10] sm:$0xff pattern:$0x73625140] }
  0x1a   : > { %296 = vmatpush.bf16.msra.mxu0 %v283_v6  ;;  %309 = vmatpush.bf16.msra.mxu1 %v285_v7  ;;  %v287_v9 = vsel %vm282_vm0, %v277_v8, 0 }
  0x1b   : > { %322 = vmatpush.bf16.msra.mxu2 %v287_v9 }
  0x1d   : > { %494 = vmatmul.msk.bf16.vlgmr.msra.gmra.mxu0 %vm278_vm1, %v265_v10  ;;  %495 = vmatmul.msk.bf16.vlgmr.msra.gmra.mxu1 %vm278_vm1, %v265_v10 }
  0x1e   : > { %496 = vmatmul.msk.bf16.vlgmr.msra.gmra.mxu2 %vm278_vm1, %v265_v10 }
  0x80   : > { %v271_v11 = vpop.permute.xlu0 %270 }
  0x88   : > { %v339_v31 = vpop.permute.xlu0 %338 }
  0x9a   : > { %v298_v12 = vpop.f32.mrf.mxu0  ;;  %v311_v13 = vpop.f32.mrf.mxu1 }
  0x9b   : > { %v299_v14 = vadd.f32 %v298_v12, %v271_v11  ;;  %v312_v15 = vadd.f32 %v311_v13, %v271_v11 }
  0x9d   : > { %v328_v16 = vmax.f32 %v299_v14, 0.0  ;;  %v329_v17 = vmax.f32 %v312_v15, 0.0 }
  0x9f   : > { %v332_v18 = vpack.c.bf16 %v328_v16, %v328_v16  ;;  %v333_v19 = vpack.c.bf16 %v329_v17, %v329_v17 }
  0xa1   : > { %v324_v20 = vpop.f32.mrf.mxu2  ;;  %v347_v21 = vsel %vm345_vm2, %v332_v18, 0  ;;  %v350_v22 = vsel %vm345_vm2, %v333_v19, 0 }
  0xa2   : > { %v325_v23 = vadd.f32 %v324_v20, %v271_v11  ;;  %v313_v24 = vpop.f32.mrf.mxu1  ;;  %362 = vmatpush.bf16.msra.mxu3 %v347_v21  ;;  %375 = vmatpush.bf16.msrb.mxu0 %v350_v22  ;;  %v300_v26 = vpop.f32.mrf.mxu0 }
  0xa4   : > { %v330_v27 = vmax.f32 %v325_v23, 0.0 }
  0xa5   : > { %497 = vmatmul.msk.bf16.vlgmr.msra.gmra.mxu3 %vm341_vm3, %v331_v25  ;;  %498 = vmatmul.msk.bf16.vlgmr.msrb.gmra.mxu0 %vm341_vm3, %v331_v25 }
  0xa6   : > { %v334_v28 = vpack.c.bf16 %v330_v27, %v330_v27 }
  0xa8   : > { %v353_v29 = vsel %vm345_vm2, %v334_v28, 0 }
  0xa9   : > { %v326_v30 = vpop.f32.mrf.mxu2  ;;  %388 = vmatpush.bf16.msrb.mxu1 %v353_v29 }
  0xac   : > { %499 = vmatmul.msk.bf16.vlgmr.msrb.gmra.mxu1 %vm341_vm3, %v331_v25 }
 0x122   : > { %v377_v32 = vpop.f32.mrf.mxu0 }
 0x123   : > { %v378_v33 = vadd.f32 %v377_v32, %v339_v31 }
 0x125   : > { %v395_v34 = vmax.f32 %v378_v33, 0.0 }
 0x127   : > { %398 = vst [vmem:[%s262_s12 + $0x8] sm:$0xff] %v395_v34 }
 0x128   : > { %v364_v35 = vpop.f32.mrf.mxu3 }
 0x129   : > { %v365_v36 = vadd.f32 %v364_v35, %v339_v31  ;;  %v390_v37 = vpop.f32.mrf.mxu1 }
 0x12a   : > { %v391_v38 = vadd.f32 %v390_v37, %v339_v31  ;;  %v379_v39 = vpop.f32.mrf.mxu0 }
 0x12b   : > { %v394_v40 = vmax.f32 %v365_v36, 0.0 }
 0x12c   : > { %v396_v41 = vmax.f32 %v391_v38, 0.0 }
 0x12d   : > { %397 = vst [vmem:[%s262_s12] sm:$0xff] %v394_v40 }
 0x12e   : > { %399 = vst [vmem:[%s262_s12 + $0x10] sm:$0xff] %v396_v41 }
 0x130   : > { %v366_v42 = vpop.f32.mrf.mxu3 }
 0x131   : > { %v392_v43 = vpop.f32.mrf.mxu1 }
 0x132 PF: > { %s15_s20 = sadd.s32 1, %s552_s20   ;;  %s643_s18 = smov %s548_s19 }
 0x133   : > { %p12_p5 = scmp.ge.s32.totalorder %s15_s20, 4   ;;  %s644_s19 = smov %s646_s21 }
 0x135   :  { %14 = sbr.rel (!%p12_p5) target bundleno = 2 (0x2), region = 70 }

</bundles_post_ra>
